<compile_context>
chip_gen: v6e
topology: v6e:2x2x1
jax: 0.10.0
libtpu: 0.0.40
codegen_flags: <defaults>
</compile_context>

<pallas_src>
import jax
import jax.numpy as jnp
from jax.experimental import pallas as pl
from jax.experimental.pallas import tpu as pltpu


def attn_pool_kernel(x_ref, mask_ref, w1_ref, b1_ref, w2_ref, b2_ref, out_ref):
    # x_ref:    (Bt, S, H)  tile of batch elements
    # mask_ref: (Bt, S)
    # w1_ref:   (H, H)      pre-transposed so y = x @ w1 + b1
    # b1_ref:   (1, H)
    # w2_ref:   (1, H)      second Linear kept as a row vector
    # b2_ref:   (1, 1)      scalar in SMEM
    # out_ref:  (Bt, H)
    bt, s, h = x_ref.shape
    x = x_ref[...]                                                  # [Bt, S, H]

    # att_fc1 + tanh: one MXU matmul with M = Bt*S rows (sublane merge reshape).
    x2 = x.reshape(bt * s, h)                                       # [Bt*S, H]
    e = jnp.tanh(
        jnp.dot(x2, w1_ref[...], preferred_element_type=jnp.float32)
        + b1_ref[...]
    )                                                               # [Bt*S, H] f32

    # att_fc2 (H -> 1) as VPU multiply + lane reduce instead of an N=1 matmul.
    b2 = b2_ref[0, 0]
    logits = jnp.sum(e.reshape(bt, s, h) * w2_ref[...], axis=-1) + b2   # [Bt, S]

    # exp / mask / normalize over the sequence, lane-dense ([Bt, S], S on lanes).
    alpha = jnp.exp(logits) * mask_ref[...].astype(jnp.float32)        # [Bt, S]
    denom = jnp.sum(alpha, axis=-1, keepdims=True) + 1e-8              # [Bt, 1]
    alpha = alpha / denom                                              # [Bt, S]

    # Weighted sum over S (broadcast alpha over H, sublane reduce): bmm(x^T, a).
    out_ref[...] = jnp.sum(
        x.astype(jnp.float32) * alpha[:, :, None], axis=1
    ).astype(out_ref.dtype)                                            # [Bt, H]


def _round_up(n: int, m: int) -> int:
    return ((n + m - 1) // m) * m


def attention_pooling(x, attn_mask, w1, b1, w2, b2, *, block_b=None):
    """x: [B, S, H], attn_mask: [B, S] (or None). Returns [B, H]."""
    B, S, H = x.shape
    if attn_mask is None:
        attn_mask = jnp.ones((B, S), dtype=x.dtype)
    mask = attn_mask.astype(x.dtype)

    if block_b is None:
        # Batch tile: multiple of 8 sublanes, sized so Bt*S ~ 256 rows feed the MXU.
        block_b = min(_round_up(B, 8), _round_up(max(1, 256 // max(S, 1)), 8))
    block_b = max(8, _round_up(block_b, 8))

    # Pad the batch so it divides evenly into tiles; padded rows are sliced off.
    Bp = _round_up(B, block_b)
    if Bp != B:
        x = jnp.pad(x, ((0, Bp - B), (0, 0), (0, 0)))
        mask = jnp.pad(mask, ((0, Bp - B), (0, 0)))

    # PyTorch Linear stores weight as [out, in]; pre-transpose W1 so the kernel
    # computes x @ W1.  w2 stays a (1, H) row for the VPU dot-product.
    w1_t = w1.T                      # [H, H]
    b1_2d = b1.reshape(1, H)         # [1, H]
    w2_row = w2.reshape(1, H)        # [1, H]
    b2_2d = b2.reshape(1, 1)         # [1, 1] -> SMEM scalar

    out = pl.pallas_call(
        attn_pool_kernel,
        out_shape=jax.ShapeDtypeStruct((Bp, H), x.dtype),
        grid_spec=pltpu.PrefetchScalarGridSpec(
            num_scalar_prefetch=0,
            grid=(Bp // block_b,),
            in_specs=[
                pl.BlockSpec((block_b, S, H), lambda b: (b, 0, 0)),   # x tile
                pl.BlockSpec((block_b, S), lambda b: (b, 0)),         # mask tile
                pl.BlockSpec((H, H), lambda b: (0, 0)),               # W1^T
                pl.BlockSpec((1, H), lambda b: (0, 0)),               # b1
                pl.BlockSpec((1, H), lambda b: (0, 0)),               # w2 row
                pl.BlockSpec(memory_space=pltpu.MemorySpace.SMEM),    # b2 scalar
            ],
            out_specs=pl.BlockSpec((block_b, H), lambda b: (b, 0)),
        ),
        compiler_params=pltpu.CompilerParams(
            dimension_semantics=("parallel",),
        ),
    )(x, mask, w1_t, b1_2d, w2_row, b2_2d)
    return out[:B]


def reference(x, attn_mask, w1, b1, w2, b2):
    e = jnp.tanh(x @ w1.T + b1)
    alpha = jnp.exp(e @ w2.T + b2)
    if attn_mask is not None:
        alpha = alpha * attn_mask[:, :, None]
    alpha = alpha / (jnp.sum(alpha, axis=1, keepdims=True) + 1e-8)
    out = jnp.einsum("bsh,bsx->bhx", x, alpha)
    return out.reshape(x.shape[0], -1)


if __name__ == "__main__":
    initializer_range = 0.02
    key = jax.random.PRNGKey(0)
    kx, km, kw1, kb1, kw2 = jax.random.split(key, 5)

    # Case 1: batch tiled across two grid steps (B=16, Bt=8, S=8, H=32).
    B, S, H = 16, 8, 32
    x = jax.random.normal(kx, (B, S, H), dtype=jnp.float32)
    attn_mask = (jax.random.uniform(km, (B, S)) > 0.3).astype(jnp.float32)
    attn_mask = attn_mask.at[:, 0].set(1.0)   # at least one unmasked token/row

    # Linear weights ~ N(0, initializer_range); biases nonzero to exercise paths.
    w1 = initializer_range * jax.random.normal(kw1, (H, H), dtype=jnp.float32)
    b1 = 0.01 * jax.random.normal(kb1, (H,), dtype=jnp.float32)
    w2 = initializer_range * jax.random.normal(kw2, (1, H), dtype=jnp.float32)
    b2 = jnp.array([0.1], dtype=jnp.float32)

    out = jax.block_until_ready(
        attention_pooling(x, attn_mask, w1, b1, w2, b2, block_b=8)
    )
    ref = reference(x, attn_mask, w1, b1, w2, b2)
    assert out.shape == (B, H)
    assert jnp.allclose(out, ref, atol=1e-5, rtol=1e-5)

    # Case 2: small batch (B=2) exercising batch padding + default tile choice.
    x_small, m_small = x[:2], attn_mask[:2]
    out2 = jax.block_until_ready(
        attention_pooling(x_small, m_small, w1, b1, w2, b2)
    )
    ref2 = reference(x_small, m_small, w1, b1, w2, b2)
    assert out2.shape == (2, H)
    assert jnp.allclose(out2, ref2, atol=1e-5, rtol=1e-5)

    print("KERNEL_OK")
</pallas_src>

<mosaic_0001>
module attributes {stable_mosaic.version = 11 : i64} {
  func.func @attn_pool_kernel(%arg0: i32, %arg1: memref<8x8x32xf32, #tpu.memory_space<vmem>>, %arg2: memref<8x8xf32, #tpu.memory_space<vmem>>, %arg3: memref<32x32xf32, #tpu.memory_space<vmem>>, %arg4: memref<1x32xf32, #tpu.memory_space<vmem>>, %arg5: memref<1x32xf32, #tpu.memory_space<vmem>>, %arg6: memref<1x1xf32, #tpu.memory_space<smem>>, %arg7: memref<8x32xf32, #tpu.memory_space<vmem>>) attributes {dimension_semantics = [#tpu.dimension_semantics<parallel>], iteration_bounds = array<i64: 2>, scalar_prefetch = 0 : i64, scratch_operands = 0 : i64, tpu.core_type = #tpu.core_type<tc>, window_params = [{transform_indices = @transform_0, window_bounds = array<i64: 8, 8, 32>}, {transform_indices = @transform_1, window_bounds = array<i64: 8, 8>}, {pipeline_mode = #tpu.pipeline_mode<synchronous>, transform_indices = @transform_2, window_bounds = array<i64: 32, 32>}, {pipeline_mode = #tpu.pipeline_mode<synchronous>, transform_indices = @transform_3, window_bounds = array<i64: 1, 32>}, {pipeline_mode = #tpu.pipeline_mode<synchronous>, transform_indices = @transform_4, window_bounds = array<i64: 1, 32>}, {transform_indices = @transform_5, window_bounds = array<i64: 1, 1>}, {transform_indices = @transform_6, window_bounds = array<i64: 8, 32>}]} {
    %c0 = arith.constant 0 : index
    %c0_0 = arith.constant 0 : index
    %c0_1 = arith.constant 0 : index
    %0 = vector.load %arg1[%c0, %c0_0, %c0_1] : memref<8x8x32xf32, #tpu.memory_space<vmem>>, vector<8x8x32xf32>
    %1 = vector.shape_cast %0 : vector<8x8x32xf32> to vector<64x32xf32>
    %c0_2 = arith.constant 0 : index
    %c0_3 = arith.constant 0 : index
    %2 = vector.load %arg3[%c0_2, %c0_3] : memref<32x32xf32, #tpu.memory_space<vmem>>, vector<32x32xf32>
    %cst = arith.constant dense<0.000000e+00> : vector<64x32xf32>
    %3 = tpu.matmul %1, %2, %cst {dimension_numbers = #tpu.dot_dimension_numbers<[1], [0], [0], [1], [0, 0, 1, 1], [], []>} : vector<64x32xf32>, vector<32x32xf32>, vector<64x32xf32> -> vector<64x32xf32>
    %c0_4 = arith.constant 0 : index
    %c0_5 = arith.constant 0 : index
    %4 = vector.load %arg4[%c0_4, %c0_5] : memref<1x32xf32, #tpu.memory_space<vmem>>, vector<1x32xf32>
    %5 = vector.broadcast %4 : vector<1x32xf32> to vector<64x32xf32>
    %6 = arith.addf %3, %5 : vector<64x32xf32>
    %7 = math.tanh %6 : vector<64x32xf32>
    %c0_6 = arith.constant 0 : index
    %c0_7 = arith.constant 0 : index
    %8 = memref.load %arg6[%c0_6, %c0_7] : memref<1x1xf32, #tpu.memory_space<smem>>
    %9 = vector.shape_cast %7 : vector<64x32xf32> to vector<8x8x32xf32>
    %c0_8 = arith.constant 0 : index
    %c0_9 = arith.constant 0 : index
    %10 = vector.load %arg5[%c0_8, %c0_9] : memref<1x32xf32, #tpu.memory_space<vmem>>, vector<1x32xf32>
    %11 = vector.shape_cast %10 : vector<1x32xf32> to vector<1x1x32xf32>
    %12 = vector.broadcast %11 : vector<1x1x32xf32> to vector<8x8x32xf32>
    %13 = arith.mulf %9, %12 : vector<8x8x32xf32>
    %cst_10 = arith.constant dense<0.000000e+00> : vector<8x8xf32>
    %14 = vector.multi_reduction <add>, %13, %cst_10 [2] : vector<8x8x32xf32> to vector<8x8xf32>
    %15 = vector.broadcast %8 : f32 to vector<8x8xf32>
    %16 = arith.addf %14, %15 : vector<8x8xf32>
    %17 = math.exp %16 : vector<8x8xf32>
    %c0_11 = arith.constant 0 : index
    %c0_12 = arith.constant 0 : index
    %18 = vector.load %arg2[%c0_11, %c0_12] : memref<8x8xf32, #tpu.memory_space<vmem>>, vector<8x8xf32>
    %19 = arith.mulf %17, %18 : vector<8x8xf32>
    %cst_13 = arith.constant dense<0.000000e+00> : vector<8xf32>
    %20 = vector.multi_reduction <add>, %19, %cst_13 [1] : vector<8x8xf32> to vector<8xf32>
    %21 = vector.shape_cast %20 : vector<8xf32> to vector<8x1xf32>
    %cst_14 = arith.constant 9.99999993E-9 : f32
    %22 = vector.broadcast %cst_14 : f32 to vector<8x1xf32>
    %23 = arith.addf %21, %22 : vector<8x1xf32>
    %24 = vector.broadcast %23 : vector<8x1xf32> to vector<8x8xf32>
    %25 = arith.divf %19, %24 : vector<8x8xf32>
    %26 = vector.shape_cast %25 : vector<8x8xf32> to vector<8x8x1xf32>
    %27 = vector.broadcast %26 : vector<8x8x1xf32> to vector<8x8x32xf32>
    %28 = arith.mulf %0, %27 : vector<8x8x32xf32>
    %cst_15 = arith.constant dense<0.000000e+00> : vector<8x32xf32>
    %29 = vector.multi_reduction <add>, %28, %cst_15 [1] : vector<8x8x32xf32> to vector<8x32xf32>
    %c0_16 = arith.constant 0 : index
    %c0_17 = arith.constant 0 : index
    %30 = vector.load %arg7[%c0_16, %c0_17] : memref<8x32xf32, #tpu.memory_space<vmem>>, vector<8x32xf32>
    tpu.vector_store %arg7[%c0_16, %c0_17], %29 {strides = array<i32>} : memref<8x32xf32, #tpu.memory_space<vmem>>, vector<8x32xf32>,
    return
  }
  func.func @transform_0(%arg0: i32) -> (i32, i32, i32) {
    %c0_i32 = arith.constant 0 : i32
    %c0_i32_0 = arith.constant 0 : i32
    %c0_i32_1 = arith.constant 0 : i32
    return %arg0, %c0_i32, %c0_i32_0 : i32, i32, i32
  }
  func.func @transform_1(%arg0: i32) -> (i32, i32) {
    %c0_i32 = arith.constant 0 : i32
    %c0_i32_0 = arith.constant 0 : i32
    return %arg0, %c0_i32 : i32, i32
  }
  func.func @transform_2(%arg0: i32) -> (i32, i32) {
    %c0_i32 = arith.constant 0 : i32
    %c0_i32_0 = arith.constant 0 : i32
    %c0_i32_1 = arith.constant 0 : i32
    return %c0_i32, %c0_i32_0 : i32, i32
  }
  func.func @transform_3(%arg0: i32) -> (i32, i32) {
    %c0_i32 = arith.constant 0 : i32
    %c0_i32_0 = arith.constant 0 : i32
    %c0_i32_1 = arith.constant 0 : i32
    return %c0_i32, %c0_i32_0 : i32, i32
  }
  func.func @transform_4(%arg0: i32) -> (i32, i32) {
    %c0_i32 = arith.constant 0 : i32
    %c0_i32_0 = arith.constant 0 : i32
    %c0_i32_1 = arith.constant 0 : i32
    return %c0_i32, %c0_i32_0 : i32, i32
  }
  func.func @transform_5(%arg0: i32) -> (i32, i32) {
    %c0_i32 = arith.constant 0 : i32
    %c0_i32_0 = arith.constant 0 : i32
    %c0_i32_1 = arith.constant 0 : i32
    return %c0_i32, %c0_i32_0 : i32, i32
  }
  func.func @transform_6(%arg0: i32) -> (i32, i32) {
    %c0_i32 = arith.constant 0 : i32
    %c0_i32_0 = arith.constant 0 : i32
    return %arg0, %c0_i32 : i32, i32
  }
}

</mosaic_0001>

<bundles_post_ra>
// kernel: tpu_custom_call.1
= control target key start
LH: loop header
LB: loop body
LE: loop exit
PB: predicated region body
PF: predicated region fallthrough
CT: control target
= control target key end

     0   :  { %s1670_s0 = inlined_call_operand.hbm [shape: f32[16,8,32], index: 0, kind: input, shape index: {}]   ;;  %s1671_s1 = inlined_call_operand.vmem [shape: f32[16,8], index: 1, kind: input, shape index: {}]   ;;  %s1672_s2 = inlined_call_operand.hbm [shape: f32[32,32], index: 2, kind: input, shape index: {}]   ;;  %s1673_s3 = inlined_call_operand.vmem [shape: f32[1,32], index: 3, kind: input, shape index: {}]   ;;  %s1674_s4 = inlined_call_operand.vmem [shape: f32[1,32], index: 4, kind: input, shape index: {}]   ;;  %s1675_s5 = inlined_call_operand.<no memory space> [shape: f32[1,1], index: 5, kind: input, shape index: {}]   ;;  %s1676_s6 = inlined_call_operand.hbm [shape: f32[16,32], index: 6, kind: output, shape index: {}]  }
   0x1   :  { %11 = sst [smem:[#allocation2]] %s1675_s5 }
   0x2   :  { %12 = vsyncpa [#allocation4], 0 }
   0x3   :  { %14 = vsyncpa [#allocation4 + $0x1], 0 }
   0x4   :  { %15 = vsyncpa [#allocation7], 0 }
   0x5   :  { %16 = vsyncpa [#allocation5], 0 }
   0x6   :  { %18 = vsyncpa [#allocation5 + $0x1], 0  ;;  %s1315_s23 = smov 0   ;;  %s1317_s24 = smov 0  }
   0x7   :  { %s1319_s25 = smov 0   ;;  %s1321_s26 = smov 0  }
   0x8 LB: > { %s1336_s5 = sadd.s32 4294967295, %s1269_s26   ;;  %s970_s27 = sadd.s32 4294967294, %s1269_s26   ;;  %s1269_s26 = sphi %s1321_s26, %s1700_s26   ;;  %s1265_s25 = sphi %s1319_s25, %s1699_s25   ;;  %s1261_s24 = sphi %s1317_s24, %s1698_s24   ;;  %s1257_s23 = sphi %s1315_s23, %s1697_s23  }
   0x9   : > { %p44_p0 = scmp.ne.s32.totalorder %s1261_s24, %s1257_s23  ;;  %p1677_p1 = scmp.eq.s32.totalorder %s1336_s5, 0 }
   0xa   : > { %p184_p3 = scmp.eq.s32.totalorder %s970_s27, 1  ;;  %p971_p5 = scmp.ge.s32.totalorder %s1269_s26, 1 }
   0xb   : > { %p1345_p4 = por %p1677_p1, %p44_p0  ;;  %p191_p7 = scmp.lt.s32.totalorder %s1269_s26, 3 }
   0xc   : > { %p1350_p6 = por %p184_p3, %p44_p0  ;;  %s1271_s7 = smov [#allocation6]  }
   0xd   : > { %s1682_s28 = scalar_select %p1345_p4, 1, 0 }
   0xe   : > { %s1683_s29 = scalar_select %p1350_p6, 1, 0 }
   0xf   : > { %p1355_p8 = pnand %p971_p5, %p191_p7  ;;  %s203_s8 = sshll.u32 %s1271_s7, 4  ;;  %s204_s8 = int_to_ptr.vmem [resolvable:$true] %s203_s8 }
  0x10   : > { %s1369_s10 = sadd.s32 1, %s1269_s26   ;;  %s31_s11 = sadd.s32 1, %s1265_s25 }
  0x11   : > { %s1684_s30 = scalar_select %p1355_p8, 1, 0 }
  0x12   : > { %p1045_p9 = pneg %p1355_p8  ;;  %s28_s12 = ssub.s32 %s1269_s26, %s1369_s10 }
  0x13   : > { %s1158_s13 = scalar_lea.vmem %s204_s8, 512  ;;  %p1166_p5 = scmp.lt.s32.totalorder %s204_s8, %s204_s8 }
  0x14   : > { %p1364_p11 = pnand %p1045_p9, %p1677_p1  ;;  %p1159_p13 = scmp.ne.s32.totalorder %s204_s8, %s1158_s13 }
  0x15   : > { %p1167_p7 = scmp.lt.s32.totalorder %s1158_s13, %s1158_s13 }
  0x16   : > { %p1149_p12 = pneg %p1364_p11 }
  0x17   : > { %p1168_p10 = por %p1167_p7, %p1166_p5 }
  0x18   : > { %p1161_p0 = pnand %p1159_p13, %p1149_p12 }
  0x1a   : > { %p1162_p3 = pneg %p1161_p0 }
  0x1c   : > { %p1169_p2 = pnand %p1168_p10, %p1162_p3 }
  0x1e   : > { %1172 = shalt.err (!%p1169_p2)
}
  0x1f   : > { %s1678_s14 = smov 128   ;;  %s1273_s15 = smov 8  }
  0x20   : > { %1048 = dma.hbm_to_vmem [thread:$0]  (!%p1364_p11), %s1672_s2, 512, %s204_s8, [#allocation7], %s1678_s14, %s1678_s14, %s1273_s15  }
  0x21   : > { %p29_p2 = scmp.eq.s32.totalorder %s28_s12, 0  ;;  %p38_p9 = scmp.ne.s32.totalorder %s1265_s25, %s1261_s24 }
  0x22   : > { %p39_p10 = scmp.eq.s32.totalorder %s1269_s26, 0  ;;  %p1058_p12 = scmp.lt.s32.totalorder %s1269_s26, 2 }
  0x23   : > { %s1389_s18 = scalar_select %p29_p2, %s1265_s25, %s31_s11  }
  0x24   : > { %p40_p13 = por %p39_p10, %p38_p9  ;;  %p1686_p0 = scmp.eq.s32.totalorder %s1336_s5, 1 }
  0x25   : > { %s226_s20 = sand.u32 1, %s1265_s25   ;;  %s996_s21 = sshll.u32 %s1269_s26, 10 }
  0x26   : > { %p1393_p3 = por %p1686_p0, %p38_p9  ;;  %s974_s22 = sshll.u32 %s226_s20, 6 }
  0x27   : > { %s1402_s9 = scalar_lea.hbm %s1670_s0, %s996_s21  ;;  %s230_s8 = scalar_lea.vmem [#allocation3], %s974_s22 }
  0x28   : > { %s1687_s19 = scalar_select %p1393_p3, 1, 0 }
  0x29   : > { %s237_s11 = sshll.u32 %s230_s8, 4  ;;  %p1404_p11 = pnand %p1058_p12, %p40_p13  ;;  %s1408_s11 = int_to_ptr.vmem [resolvable:$true] %s237_s11 }
  0x2a   : > { %s1410_s13 = scalar_lea.sflag [#allocation4], %s226_s20  ;;  %s1173_s16 = scalar_lea.hbm %s1402_s9, 1024 }
  0x2b   : > { %p1174_p5 = scmp.ne.s32.totalorder %s1402_s9, %s1173_s16  ;;  %p1175_p7 = pneg %p1404_p11 }
  0x2c   : > { %s1178_s22 = scalar_lea.hbm %s1670_s0, 2048  ;;  %p1179_p10 = scmp.lt.s32.totalorder %s1402_s9, %s1670_s0 }
  0x2d   : > { %p1176_p2 = pnand %p1175_p7, %p1174_p5  ;;  %p1180_p12 = scmp.lt.s32.totalorder %s1178_s22, %s1173_s16 }
  0x2f   : > { %p1177_p9 = pneg %p1176_p2  ;;  %p1181_p13 = por %p1180_p12, %p1179_p10 }
  0x31   : > { %p1182_p0 = pnand %p1181_p13, %p1177_p9 }
  0x33   : > { %1185 = shalt.err (!%p1182_p0)
}
  0x34   : > { %s1186_s20 = scalar_lea.vmem %s1408_s11, 1024  ;;  %s1274_s8 = smov [#allocation3]  }
  0x35   : > { %p1187_p1 = scmp.ne.s32.totalorder %s1408_s11, %s1186_s20  ;;  %s1191_s14 = sshll.u32 %s1274_s8, 4  ;;  %s1192_s14 = int_to_ptr.vmem [resolvable:$false] %s1191_s14 }
  0x36   : > { %s1193_s17 = scalar_lea.vmem %s1192_s14, 2048  ;;  %p1194_p2 = scmp.lt.s32.totalorder %s1408_s11, %s1192_s14 }
  0x37   : > { %p1189_p6 = pnand %p1187_p1, %p1175_p7  ;;  %p1195_p3 = scmp.lt.s32.totalorder %s1193_s17, %s1186_s20 }
  0x39   : > { %p1190_p5 = pneg %p1189_p6  ;;  %p1196_p4 = por %p1195_p3, %p1194_p2 }
  0x3b   : > { %p1197_p8 = pnand %p1196_p4, %p1190_p5 }
  0x3d   : > { %1200 = shalt.err (!%p1197_p8)
}
  0x3e   : > { %s1689_s16 = smov 128   ;;  %p1690_p1 = scmp.ne.s32.totalorder %s1684_s30, 0 }
  0x3f   : > { %1052 = dma.hbm_to_vmem [thread:$0]  (!%p1404_p11), %s1402_s9, 1024, %s1408_s11, %s1410_s13, %s1689_s16, %s1689_s16, %s1273_s15  }
  0x40   : > { %256 = sbr.rel (%p1690_p1) target bundleno = 938 (0x3aa), region = 44  ;;  %s1437_s21 = sand.u32 (!%p1690_p1), 1, %s1261_s24  }
  0x41   : > { %s978_s14 = sshll.u32 (!%p1690_p1), %s1437_s21, 6  ;;  %s259_s22 = scalar_lea.sflag (!%p1690_p1), [#allocation4], %s1437_s21 }
  0x42   : > { %s1441_s27 = scalar_lea.vmem (!%p1690_p1), [#allocation3], %s978_s14  ;;  %p1691_p4 = scmp.ne.s32.totalorder (!%p1690_p1), %s1682_s28, 0 }
  0x45   : > { %1244 = dma.done.wait (%p1691_p4), %s259_s22, 1024  }
  0x46   : > { %1246 = vsyncadd (%p1691_p4), %s259_s22, 4294966272  ;;  %p1692_p6 = scmp.eq.s32.totalorder %s1336_s5, 0 }
  0x48   : > { %1248 = dma.done.wait (%p1692_p6), [#allocation7], 512   ;;  %p1693_p8 = pmov %p1692_p6 }
  0x49   : > { %p300_p3 = scmp.lt.s32.totalorder %s1336_s5, 1  ;;  %v528_v0 = vlaneseq  ;;  %v315_v1 = vld [vmem:[#allocation6 + $0x18] sm:$0xff]  ;;  %v314_v2 = vld [vmem:[#allocation6 + $0x10] sm:$0xff]  ;;  %v313_v4 = vld [vmem:[#allocation6 + $0x8] sm:$0xff]  ;;  %vm323_vm0 = vcmask 261120   ;;  %s461_s8 = sld [smem:[#allocation2]] }
  0x4a   : > { %1250 = vsyncadd (%p1693_p8), [#allocation7], 4294966784  ;;  %1009 = vmatprep.subr.mxu0 %v315_v1  ;;  %1029 = vmatprep.subr.mxu1 %v315_v1  ;;  %v312_v5 = vld [vmem:[#allocation6] sm:$0xff]  ;;  %v1470_v11 = vld [vmem:[%s1441_s27 + $0x8] sm:$0xff]  ;;  %vm666_vm1 = vcmask 1041409   ;;  %vm668_vm2 = vcmask 1042434  }
  0x4b   : > { %s301_s30 = scalar_select %p300_p3, %s1336_s5, 1  ;;  %v1454_v3 = vshrl.u32 %v528_v0, 7  ;;  %1010 = vmatpush3.msra.mxu0 %v315_v1  ;;  %1033 = vmatpush3.msra.mxu1 %v315_v1  ;;  %v1464_v9 = vld [vmem:[%s1441_s27] sm:$0xff]  ;;  %v1473_v12 = vld [vmem:[%s1441_s27 + $0x28] sm:$0xff]  ;;  %v1476_v13 = vld [vmem:[%s1441_s27 + $0x10] sm:$0xff]  ;;  %vm670_vm3 = vcmask 1043459  }
  0x4c   : > { %1011 = vmatprep.subr.mxu0 %v314_v2  ;;  %1030 = vmatprep.subr.mxu1 %v314_v2  ;;  %v1467_v10 = vld [vmem:[%s1441_s27 + $0x20] sm:$0xff]  ;;  %v1479_v14 = vld [vmem:[%s1441_s27 + $0x30] sm:$0xff]  ;;  %v1500_v19 = vld [vmem:[%s1441_s27 + $0x18] sm:$0xff]  ;;  %vm672_vm4 = vcmask 1044484   ;;  %vm674_vm5 = vcmask 1045509   ;;  %vm676_vm6 = vcmask 1046534  }
  0x4d   : > { %s981_s15 = sshll.u32 %s301_s30, 3  ;;  %1012 = vmatpush3.msra.mxu0 %v314_v2  ;;  %1034 = vmatpush3.msra.mxu1 %v314_v2  ;;  %v537_v6 = vsub.s32 1, %v1454_v3  ;;  %v530_v7 = vsub.s32 0, %v1454_v3  ;;  %v544_v16 = vsub.s32 2, %v1454_v3  ;;  %v558_v18 = vsub.s32 4, %v1454_v3  ;;  %v1505_v20 = vld [vmem:[%s1441_s27 + $0x38] sm:$0xff] }
  0x4e   : > { %s303_s11 = scalar_lea.vmem %s1671_s1, %s981_s15  ;;  %1013 = vmatprep.subr.mxu0 %v313_v4  ;;  %1031 = vmatprep.subr.mxu1 %v313_v4  ;;  %v551_v22 = vsub.s32 3, %v1454_v3  ;;  %v565_v25 = vsub.s32 5, %v1454_v3  ;;  %v982_v27 = vld [vmem:[%s1673_s3] ss:$0 sm:$0xff]  ;;  %vm678_vm7 = vcmask 1047559   ;;  %vm681_vm8 = vcmask 64512  }
  0x4f   : > { %v1461_v8 = vld [vmem:[%s303_s11] sm:$0xff]  ;;  %1014 = vmatpush3.msra.mxu0 %v313_v4  ;;  %1035 = vmatpush3.msra.mxu1 %v313_v4  ;;  %s980_s17 = sshll.u32 %s1437_s21, 3  ;;  %s993_s16 = sshll.u32 %s1336_s5, 7 }
  0x50   : > { %1015 = vmatprep.subr.mxu0 %v312_v5  ;;  %1032 = vmatprep.subr.mxu1 %v312_v5  ;;  %v538_v15 = vrot.slane %v1461_v8, %v537_v6  ;;  %v531_v17 = vrot.slane %v1461_v8, %v530_v7  ;;  %v545_v21 = vrot.slane %v1461_v8, %v544_v16  ;;  %v991_v44 = vld [vmem:[%s1674_s4] ss:$0 sm:$0xff]  ;;  %s298_s14 = scalar_lea.vmem [#allocation8], %s980_s17  ;;  %s1631_s15 = scalar_lea.hbm %s1676_s6, %s993_s16 }
  0x51   : > { %1016 = vmatpush3.msra.mxu0 %v312_v5  ;;  %1036 = vmatpush3.msra.mxu1 %v312_v5  ;;  %v559_v23 = vrot.slane %v1461_v8, %v558_v18  ;;  %v552_v24 = vrot.slane %v1461_v8, %v551_v22  ;;  %v566_v26 = vrot.slane %v1461_v8, %v565_v25  ;;  %s878_s22 = sshll.u32 %s298_s14, 4  ;;  %s865_s5 = scalar_lea.sflag [#allocation5], %s1437_s21  ;;  %s879_s22 = int_to_ptr.vmem [resolvable:$true] %s878_s22 }
  0x52   : > { %1017 = vmatprep.mubr.msk.f32.mxu0 %vm323_vm0, %v1464_v9  ;;  %1023 = vmatprep.mubr.msk.f32.mxu1 %vm323_vm0, %v1467_v10  ;;  %s1201_s28 = scalar_lea.vmem %s879_s22, 128  ;;  %p1694_p7 = scmp.ne.s32.totalorder %s1687_s19, 0 }
  0x53   : > { %1018 = vmatmul.mubr.msk.f32.vlgmr.msra.gmra.mxu0 %vm323_vm0, %v1470_v11  ;;  %1024 = vmatmul.mubr.msk.f32.vlgmr.msra.gmra.mxu1 %vm323_vm0, %v1473_v12  ;;  %p1202_p11 = scmp.ne.s32.totalorder %s879_s22, %s1201_s28  ;;  %s1276_s9 = smov [#allocation8]  }
  0x54   : > { %1020 = vmatprep.mubr.msk.f32.mxu0 %vm323_vm0, %v1476_v13  ;;  %1026 = vmatprep.mubr.msk.f32.mxu1 %vm323_vm0, %v1479_v14  ;;  %s1205_s11 = sshll.u32 %s1276_s9, 4  ;;  %s1206_s11 = int_to_ptr.vmem [resolvable:$false] %s1205_s11 }
  0x55   : > { %540 = vbcast.lane.b32.xlu1 %v538_v15, 256  ;;  %533 = vbcast.lane.b32.xlu0 %v531_v17, 256  ;;  %v579_v17 = vsub.s32 7, %v1454_v3  ;;  %p1203_p9 = pnand %p1202_p11, %p1694_p7  ;;  %s1207_s12 = scalar_lea.vmem %s1206_s11, 256 }
  0x56   : > { %p1208_p12 = scmp.lt.s32.totalorder %s879_s22, %s1206_s11  ;;  %p1209_p13 = scmp.lt.s32.totalorder %s1207_s12, %s1201_s28 }
  0x57   : > { %1021 = vmatmul.mubr.msk.f32.gmra.mxu0 %vm323_vm0, %v1500_v19  ;;  %1027 = vmatmul.mubr.msk.f32.gmra.mxu1 %vm323_vm0, %v1505_v20  ;;  %p1204_p10 = pneg %p1203_p9 }
  0x58   : > { %p1210_p0 = por %p1209_p13, %p1208_p12 }
  0x59   : > { %547 = vbcast.lane.b32.xlu1 %v545_v21, 256  ;;  %561 = vbcast.lane.b32.xlu0 %v559_v23, 256  ;;  %v580_v21 = vrot.slane %v1461_v8, %v579_v17  ;;  %v572_v23 = vsub.s32 6, %v1454_v3 }
  0x5a   : > { %p1211_p5 = pnand %p1210_p0, %p1204_p10 }
  0x5d   : > { %554 = vbcast.lane.b32.xlu1 %v552_v24, 256  ;;  %v1275_v24 = vmov 0  }
  0x5e   : > { %1098 = vset.pattern.permute.xlu0 %v1275_v24  ;;  %1097 = vset.pattern.permute.xlu1 %v1275_v24 }
  0x61   : > { %568 = vbcast.lane.b32.xlu1 %v566_v26, 256  ;;  %v573_v26 = vrot.slane %v1461_v8, %v572_v23 }
 0x113   : > { %v1019_v28 = vpop.f32.mrf.mxu0  ;;  %v1025_v29 = vpop.f32.mrf.mxu1 }
 0x114   : > { %v420_v30 = vadd.f32 %v1019_v28, %v982_v27  ;;  %v440_v31 = vadd.f32 %v1025_v29, %v982_v27  ;;  %v534_v29 = vpop.permute.xlu0 %533 }
 0x115   : > { %v414_v32 = vpop.f32.mrf.mxu0  ;;  %v434_v33 = vpop.f32.mrf.mxu1 }
 0x116   : > { %1099 = vtanh.f32 %v420_v30  ;;  %v415_v34 = vadd.f32 %v982_v27, %v414_v32  ;;  %v435_v35 = vadd.f32 %v982_v27, %v434_v33  ;;  %v501_v33 = vstv %s461_s8 }
 0x117   : > { %1101 = vtanh.f32 %v440_v31  ;;  %v1022_v36 = vpop.f32.mrf.mxu0  ;;  %v1028_v37 = vpop.f32.mrf.mxu1 }
 0x118   : > { %1103 = vtanh.f32 %v415_v34  ;;  %v430_v38 = vadd.f32 %v1022_v36, %v982_v27  ;;  %v450_v39 = vadd.f32 %v1028_v37, %v982_v27  ;;  %v562_v31 = vpop.permute.xlu0 %561 }
 0x119   : > { %1105 = vtanh.f32 %v435_v35  ;;  %v424_v40 = vpop.f32.mrf.mxu0  ;;  %v444_v41 = vpop.f32.mrf.mxu1 }
 0x11a   : > { %1107 = vtanh.f32 %v430_v38  ;;  %v445_v42 = vadd.f32 %v982_v27, %v444_v41  ;;  %v425_v43 = vadd.f32 %v982_v27, %v424_v40  ;;  %v541_v27 = vpop.permute.xlu1 %540 }
 0x11b   : > { %1109 = vtanh.f32 %v450_v39 }
 0x11c   : > { %1111 = vtanh.f32 %v445_v42 }
 0x11d   : > { %1113 = vtanh.f32 %v425_v43 }
 0x11e   : > { %v548_v28 = vpop.permute.xlu1 %547 }
 0x122   : > { %v555_v30 = vpop.permute.xlu1 %554 }
 0x123   : > { %v1100_v45 = vpop.eup %1099 }
 0x124   : > { %v1102_v46 = vpop.eup %1101  ;;  %v470_v47 = vmul.f32 %v1100_v45, %v991_v44 }
 0x125   : > { %v1104_v48 = vpop.eup %1103  ;;  %v474_v49 = vmul.f32 %v1102_v46, %v991_v44 }
 0x126   : > { %v1106_v50 = vpop.eup %1105  ;;  %v480_v51 = vsel %vm323_vm0, %v470_v47, 0.0  ;;  %v469_v52 = vmul.f32 %v1104_v48, %v991_v44  ;;  %v569_v32 = vpop.permute.xlu1 %568 }
 0x127   : > { %v1108_v53 = vpop.eup %1107  ;;  %v492_v54 = vsel %vm323_vm0, %v474_v49, 0.0  ;;  %481 = vadd.xlane.f32.xlu0 %v480_v51  ;;  %v473_v60 = vmul.f32 %v1106_v50, %v991_v44 }
 0x128   : > { %v1110_v55 = vpop.eup %1109  ;;  %493 = vadd.xlane.f32.xlu1 %v492_v54  ;;  %v472_v56 = vmul.f32 %v1108_v53, %v991_v44  ;;  %v477_v59 = vsel %vm323_vm0, %v469_v52, 0.0 }
 0x129   : > { %v476_v57 = vmul.f32 %v1110_v55, %v991_v44  ;;  %v1112_v61 = vpop.eup %1111  ;;  %v489_v1 = vsel %vm323_vm0, %v473_v60, 0.0 }
 0x12a   : > { %v486_v58 = vsel %vm323_vm0, %v472_v56, 0.0  ;;  %v1114_v62 = vpop.eup %1113  ;;  %v475_v2 = vmul.f32 %v1112_v61, %v991_v44 }
 0x12b   : > { %478 = vadd.xlane.f32.xlu0 %v477_v59  ;;  %v498_v63 = vsel %vm323_vm0, %v476_v57, 0.0  ;;  %v471_v4 = vmul.f32 %v1114_v62, %v991_v44 }
 0x12c   : > { %487 = vadd.xlane.f32.xlu1 %v486_v58  ;;  %v495_v5 = vsel %vm323_vm0, %v475_v2, 0.0 }
 0x12d   : > { %v483_v15 = vsel %vm323_vm0, %v471_v4, 0.0 }
 0x12f   : > { %490 = vadd.xlane.f32.xlu0 %v489_v1 }
 0x130   : > { %499 = vadd.xlane.f32.xlu1 %v498_v63 }
 0x133   : > { %496 = vadd.xlane.f32.xlu0 %v495_v5 }
 0x134   : > { %484 = vadd.xlane.f32.xlu1 %v483_v15 }
 0x145   : > { %582 = vbcast.lane.b32.xlu1 %v580_v21, 256 }
 0x149   : > { %575 = vbcast.lane.b32.xlu0 %v573_v26, 256 }
 0x1b0   : > { %v482_v34 = vpop.xlane.xlu0 %481 }
 0x1b1   : > { %v494_v35 = vpop.xlane.xlu1 %493  ;;  %v503_v36 = vadd.f32 %v501_v33, %v482_v34 }
 0x1b2   : > { %v507_v37 = vadd.f32 %v501_v33, %v494_v35 }
 0x1b3   : > { %v512_v38 = vmul.f32 1.442695, %v503_v36 }
 0x1b4   : > { %v520_v39 = vmul.f32 1.442695, %v507_v37  ;;  %v479_v40 = vpop.xlane.xlu0 %478 }
 0x1b5   : > { %1115 = vpow2.f32 %v512_v38  ;;  %v488_v41 = vpop.xlane.xlu1 %487  ;;  %v502_v42 = vadd.f32 %v501_v33, %v479_v40 }
 0x1b6   : > { %1117 = vpow2.f32 %v520_v39  ;;  %v505_v8 = vadd.f32 %v501_v33, %v488_v41 }
 0x1b7   : > { %v510_v43 = vmul.f32 1.442695, %v502_v42 }
 0x1b8   : > { %v516_v44 = vmul.f32 1.442695, %v505_v8  ;;  %v491_v45 = vpop.xlane.xlu0 %490 }
 0x1b9   : > { %1119 = vpow2.f32 %v510_v43  ;;  %v500_v46 = vpop.xlane.xlu1 %499  ;;  %v506_v47 = vadd.f32 %v501_v33, %v491_v45 }
 0x1ba   : > { %v509_v48 = vadd.f32 %v501_v33, %v500_v46  ;;  %1121 = vpow2.f32 %v516_v44 }
 0x1bb   : > { %v518_v49 = vmul.f32 1.442695, %v506_v47 }
 0x1bc   : > { %v524_v50 = vmul.f32 1.442695, %v509_v48  ;;  %v497_v51 = vpop.xlane.xlu0 %496 }
 0x1bd   : > { %1123 = vpow2.f32 %v518_v49  ;;  %v485_v52 = vpop.xlane.xlu1 %484  ;;  %v508_v53 = vadd.f32 %v501_v33, %v497_v51 }
 0x1be   : > { %v504_v54 = vadd.f32 %v501_v33, %v485_v52  ;;  %1125 = vpow2.f32 %v524_v50  ;;  %v633_v33 = vand.u32 127, %v528_v0 }
 0x1bf   : > { %v522_v56 = vmul.f32 1.442695, %v508_v53 }
 0x1c0   : > { %v514_v55 = vmul.f32 1.442695, %v504_v54  ;;  %v636_v36 = vsub.s32 %v633_v33, %v1454_v3 }
 0x1c1   : > { %v583_v15 = vpop.permute.xlu1 %582 }
 0x1c2   : > { %v1116_v57 = vpop.eup %1115  ;;  %1127 = vpow2.f32 %v514_v55 }
 0x1c3   : > { %v1118_v58 = vpop.eup %1117  ;;  %v1547_v59 = vmul.f32 %v1116_v57, %v541_v27  ;;  %1129 = vpow2.f32 %v522_v56 }
 0x1c4   : > { %v1549_v60 = vmul.f32 %v1118_v58, %v569_v32 }
 0x1c5   : > { %612 = vperm.xlu1 %1097, %v1547_v59  }
 0x1c6   : > { %v1120_v61 = vpop.eup %1119  ;;  %624 = vperm.xlu0 %1098, %v1549_v60  }
 0x1c7   : > { %v1553_v62 = vmul.f32 %v1120_v61, %v534_v29  ;;  %v1122_v63 = vpop.eup %1121  ;;  %v576_v29 = vpop.permute.xlu0 %575 }
 0x1c8   : > { %v1558_v4 = vmul.f32 %v1122_v63, %v555_v30 }
 0x1ca   : > { %v1124_v1 = vpop.eup %1123  ;;  %609 = vperm.xlu0 %1098, %v1553_v62  }
 0x1cb   : > { %v1556_v2 = vmul.f32 %v1124_v1, %v562_v31  ;;  %v1126_v5 = vpop.eup %1125 }
 0x1cc   : > { %v1562_v24 = vmul.f32 %v1126_v5, %v583_v15 }
 0x1cd   : > { %621 = vperm.xlu1 %1097, %v1556_v2  }
 0x1ce   : > { %618 = vperm.xlu0 %1098, %v1558_v4  }
 0x1cf   : > { %v1128_v21 = vpop.eup %1127 }
 0x1d0   : > { %v1564_v26 = vmul.f32 %v1128_v21, %v548_v28  ;;  %v1130_v27 = vpop.eup %1129 }
 0x1d1   : > { %v1568_v31 = vmul.f32 %v1130_v27, %v576_v29 }
 0x1d2   : > { %630 = vperm.xlu0 %1098, %v1562_v24   ;;  %615 = vperm.xlu1 %1097, %v1564_v26  }
 0x1d6   : > { %627 = vperm.xlu1 %1097, %v1568_v31  }
 0x240   : > { %v613_v32 = vpop.permute.xlu1 %612 }
 0x241   : > { %v625_v30 = vpop.permute.xlu0 %624  ;;  %v641_v38 = vrot.slane %v613_v32, %v636_v36 }
 0x242   : > { %v657_v44 = vrot.slane %v625_v30, %v636_v36 }
 0x245   : > { %v610_v34 = vpop.permute.xlu0 %609 }
 0x246   : > { %v637_v37 = vrot.slane %v610_v34, %v636_v36 }
 0x248   : > { %v622_v35 = vpop.permute.xlu1 %621  ;;  %v667_v41 = vsel %vm666_vm1, %v641_v38, %v637_v37 }
 0x249   : > { %v619_v28 = vpop.permute.xlu0 %618  ;;  %v653_v8 = vrot.slane %v622_v35, %v636_v36 }
 0x24a   : > { %v649_v42 = vrot.slane %v619_v28, %v636_v36 }
 0x24d   : > { %v616_v39 = vpop.permute.xlu1 %615  ;;  %v631_v0 = vpop.permute.xlu0 %630 }
 0x24e   : > { %v645_v40 = vrot.slane %v616_v39, %v636_v36  ;;  %v665_v49 = vrot.slane %v631_v0, %v636_v36 }
 0x250   : > { %v669_v43 = vsel %vm668_vm2, %v645_v40, %v667_v41 }
 0x251   : > { %v671_v45 = vsel %vm670_vm3, %v649_v42, %v669_v43  ;;  %v628_v46 = vpop.permute.xlu1 %627 }
 0x252   : > { %v661_v47 = vrot.slane %v628_v46, %v636_v36  ;;  %v673_v48 = vsel %vm672_vm4, %v653_v8, %v671_v45 }
 0x253   : > { %v675_v50 = vsel %vm674_vm5, %v657_v44, %v673_v48 }
 0x254   : > { %v677_v51 = vsel %vm676_vm6, %v661_v47, %v675_v50 }
 0x255   : > { %v679_v52 = vsel %vm678_vm7, %v665_v49, %v677_v51 }
 0x256   : > { %v682_v53 = vsel %vm681_vm8, %v679_v52, 0.0 }
 0x257   : > { %683 = vadd.xlane.f32.xlu1 %v682_v53 }
 0x2e0   : > { %v684_v54 = vpop.xlane.xlu1 %683 }
 0x2e1   : > { %v685_v55 = vadd.f32 1e-08, %v684_v54 }
 0x2e3   : > { %v690_v56 = vrot.slane %v685_v55, %v530_v7  ;;  %v694_v57 = vrot.slane %v685_v55, %v537_v6  ;;  %v698_v58 = vrot.slane %v685_v55, %v544_v16  ;;  %v702_v61 = vrot.slane %v685_v55, %v551_v22 }
 0x2e4   : > { %v706_v63 = vrot.slane %v685_v55, %v558_v18  ;;  %v710_v6 = vrot.slane %v685_v55, %v565_v25  ;;  %v714_v16 = vrot.slane %v685_v55, %v572_v23  ;;  %v718_v18 = vrot.slane %v685_v55, %v579_v17 }
 0x2e5   : > { %1131 = vrcp.f32 %v690_v56 }
 0x2e6   : > { %1133 = vrcp.f32 %v694_v57 }
 0x2e7   : > { %1135 = vrcp.f32 %v698_v58 }
 0x2e8   : > { %1137 = vrcp.f32 %v702_v61 }
 0x2e9   : > { %1139 = vrcp.f32 %v706_v63 }
 0x2ea   : > { %1141 = vrcp.f32 %v710_v6 }
 0x2eb   : > { %1143 = vrcp.f32 %v714_v16 }
 0x2ec   : > { %1145 = vrcp.f32 %v718_v18 }
 0x2f2   : > { %v1132_v1 = vpop.eup %1131 }
 0x2f3   : > { %v728_v5 = vmul.f32 %v1132_v1, %v1553_v62  ;;  %v1134_v7 = vpop.eup %1133 }
 0x2f4   : > { %v730_v15 = vmul.f32 %v1134_v7, %v1547_v59  ;;  %v1136_v22 = vpop.eup %1135 }
 0x2f5   : > { %745 = vperm.xlu0 %1098, %v728_v5   ;;  %v732_v21 = vmul.f32 %v1136_v22, %v1564_v26  ;;  %v1138_v62 = vpop.eup %1137 }
 0x2f6   : > { %v734_v25 = vmul.f32 %v1138_v62, %v1558_v4  ;;  %v1140_v27 = vpop.eup %1139 }
 0x2f7   : > { %v736_v59 = vmul.f32 %v1140_v27, %v1556_v2  ;;  %v1142_v29 = vpop.eup %1141 }
 0x2f8   : > { %v738_v23 = vmul.f32 %v1142_v29, %v1549_v60  ;;  %v1144_v30 = vpop.eup %1143 }
 0x2f9   : > { %750 = vperm.xlu0 %1098, %v730_v15   ;;  %v740_v26 = vmul.f32 %v1144_v30, %v1568_v31  ;;  %v1146_v32 = vpop.eup %1145 }
 0x2fa   : > { %v742_v3 = vmul.f32 %v1146_v32, %v1562_v24 }
 0x2fd   : > { %755 = vperm.xlu0 %1098, %v732_v21  }
 0x301   : > { %760 = vperm.xlu0 %1098, %v734_v25  }
 0x305   : > { %765 = vperm.xlu0 %1098, %v736_v59  }
 0x309   : > { %770 = vperm.xlu0 %1098, %v738_v23  }
 0x30d   : > { %775 = vperm.xlu0 %1098, %v740_v26  }
 0x311   : > { %780 = vperm.xlu0 %1098, %v742_v3  }
 0x370   : > { %v746_v17 = vpop.permute.xlu0 %745 }
 0x371   : > { %v783_v2 = vmul.f32 %v746_v17, %v1464_v9 }
 0x373   : > { %v791_v31 = vsel %vm323_vm0, %v783_v2, 0.0 }
 0x374   : > { %v751_v4 = vpop.permute.xlu0 %750  ;;  %v792_v40 = vrot.slane %v791_v31, 4 }
 0x375   : > { %v784_v33 = vmul.f32 %v751_v4, %v1470_v11 }
 0x376   : > { %v793_v43 = vadd.f32 %v792_v40, %v791_v31 }
 0x377   : > { %v798_v60 = vsel %vm323_vm0, %v784_v33, 0.0 }
 0x378   : > { %v756_v34 = vpop.permute.xlu0 %755  ;;  %v799_v24 = vrot.slane %v798_v60, 4  ;;  %v794_v50 = vrot.slane %v793_v43, 2 }
 0x379   : > { %v785_v35 = vmul.f32 %v756_v34, %v1476_v13 }
 0x37a   : > { %v800_v42 = vadd.f32 %v799_v24, %v798_v60  ;;  %v795_v61 = vadd.f32 %v794_v50, %v793_v43 }
 0x37b   : > { %v805_v36 = vsel %vm323_vm0, %v785_v35, 0.0 }
 0x37c   : > { %v761_v28 = vpop.permute.xlu0 %760  ;;  %v806_v38 = vrot.slane %v805_v36, 4  ;;  %v796_v18 = vrot.slane %v795_v61, 1 }
 0x37d   : > { %v786_v37 = vmul.f32 %v761_v28, %v1500_v19  ;;  %v801_v19 = vrot.slane %v800_v42, 2 }
 0x37e   : > { %v807_v13 = vadd.f32 %v806_v38, %v805_v36  ;;  %v797_v3 = vadd.f32 %v796_v18, %v795_v61 }
 0x37f   : > { %v812_v39 = vsel %vm323_vm0, %v786_v37, 0.0  ;;  %v802_v55 = vadd.f32 %v801_v19, %v800_v42 }
 0x380   : > { %v813_v11 = vrot.slane %v812_v39, 4  ;;  %v766_v41 = vpop.permute.xlu0 %765  ;;  %v808_v48 = vrot.slane %v807_v13, 2 }
 0x381   : > { %v787_v9 = vmul.f32 %v766_v41, %v1467_v10  ;;  %v803_v15 = vrot.slane %v802_v55, 1 }
 0x382   : > { %v814_v0 = vadd.f32 %v813_v11, %v812_v39  ;;  %v809_v57 = vadd.f32 %v808_v48, %v807_v13 }
 0x383   : > { %v819_v8 = vsel %vm323_vm0, %v787_v9, 0.0  ;;  %v804_v29 = vadd.f32 %v803_v15, %v802_v55 }
 0x384   : > { %v820_v44 = vrot.slane %v819_v8, 4  ;;  %v771_v45 = vpop.permute.xlu0 %770  ;;  %v815_v51 = vrot.slane %v814_v0, 2  ;;  %v810_v21 = vrot.slane %v809_v57, 1 }
 0x385   : > { %v788_v46 = vmul.f32 %v771_v45, %v1473_v12  ;;  %v855_v34 = vsel %vm666_vm1, %v804_v29, %v797_v3 }
 0x386   : > { %v821_v47 = vadd.f32 %v820_v44, %v819_v8  ;;  %v816_v63 = vadd.f32 %v815_v51, %v814_v0  ;;  %v811_v32 = vadd.f32 %v810_v21, %v809_v57 }
 0x387   : > { %v826_v49 = vsel %vm323_vm0, %v788_v46, 0.0 }
 0x388   : > { %v827_v52 = vrot.slane %v826_v49, 4  ;;  %v776_v53 = vpop.permute.xlu0 %775  ;;  %v822_v10 = vrot.slane %v821_v47, 2  ;;  %v817_v62 = vrot.slane %v816_v63, 1  ;;  %v856_v60 = vsel %vm668_vm2, %v811_v32, %v855_v34 }
 0x389   : > { %v789_v54 = vmul.f32 %v776_v53, %v1479_v14 }
 0x38a   : > { %v828_v56 = vadd.f32 %v827_v52, %v826_v49  ;;  %v823_v6 = vadd.f32 %v822_v10, %v821_v47 }
 0x38b   : > { %v833_v58 = vsel %vm323_vm0, %v789_v54, 0.0 }
 0x38c   : > { %v829_v12 = vrot.slane %v828_v56, 2  ;;  %v834_v1 = vrot.slane %v833_v58, 4  ;;  %v781_v5 = vpop.permute.xlu0 %780  ;;  %v824_v59 = vrot.slane %v823_v6, 1 }
 0x38d   : > { %v790_v7 = vmul.f32 %v781_v5, %v1505_v20  ;;  %v818_v20 = vadd.f32 %v817_v62, %v816_v63 }
 0x38e   : > { %v830_v16 = vadd.f32 %v829_v12, %v828_v56  ;;  %v835_v22 = vadd.f32 %v834_v1, %v833_v58  ;;  %v825_v33 = vadd.f32 %v824_v59, %v823_v6 }
 0x38f   : > { %v840_v14 = vsel %vm323_vm0, %v790_v7, 0.0  ;;  %v857_v28 = vsel %vm670_vm3, %v818_v20, %v856_v60 }
 0x390   : > { %v836_v25 = vrot.slane %v835_v22, 2  ;;  %v841_v27 = vrot.slane %v840_v14, 4  ;;  %v831_v23 = vrot.slane %v830_v16, 1  ;;  %v858_v37 = vsel %vm672_vm4, %v825_v33, %v857_v28 }
 0x392   : > { %v837_v30 = vadd.f32 %v836_v25, %v835_v22  ;;  %v842_v26 = vadd.f32 %v841_v27, %v840_v14  ;;  %v832_v2 = vadd.f32 %v831_v23, %v830_v16 }
 0x394   : > { %v838_v17 = vrot.slane %v837_v30, 1  ;;  %v843_v4 = vrot.slane %v842_v26, 2  ;;  %v859_v24 = vsel %vm674_vm5, %v832_v2, %v858_v37 }
 0x396   : > { %v844_v35 = vadd.f32 %v843_v4, %v842_v26  ;;  %v839_v36 = vadd.f32 %v838_v17, %v837_v30 }
 0x398   : > { %v845_v31 = vrot.slane %v844_v35, 1  ;;  %v860_v39 = vsel %vm676_vm6, %v839_v36, %v859_v24 }
 0x39a   : > { %v846_v38 = vadd.f32 %v845_v31, %v844_v35 }
 0x39c   : > { %v861_v40 = vsel %vm678_vm7, %v846_v38, %v860_v39 }
 0x39d   : > { %863 = vst.msk [vmem:[%s298_s14] sm:$0xff] %vm323_vm0, %v861_v40 }
 0x39e   : > { %1214 = shalt.err (!%p1211_p5)
}
 0x39f   : > { %s1215_s13 = scalar_lea.hbm %s1631_s15, 128  ;;  %s1219_s20 = scalar_lea.hbm %s1676_s6, 256 }
 0x3a0   : > { %p1216_p2 = scmp.ne.s32.totalorder %s1631_s15, %s1215_s13  ;;  %p1220_p6 = scmp.lt.s32.totalorder %s1631_s15, %s1676_s6 }
 0x3a1   : > { %p1221_p8 = scmp.lt.s32.totalorder %s1219_s20, %s1215_s13 }
 0x3a2   : > { %p1217_p1 = pnand %p1216_p2, %p1694_p7 }
 0x3a3   : > { %p1222_p3 = por %p1221_p8, %p1220_p6 }
 0x3a4   : > { %p1218_p4 = pneg %p1217_p1 }
 0x3a6   : > { %p1223_p11 = pnand %p1222_p3, %p1218_p4 }
 0x3a8   : > { %1226 = shalt.err (!%p1223_p11)
}
 0x3a9   : > { %1043 = dma.vmem_to_hbm [thread:$0]  (%p1694_p7), %s879_s22, 128, %s1631_s15, %s865_s5  }
 0x3aa PF: > { %s890_s16 = sand.u32 1, %s1257_s23   ;;  %p1695_p9 = scmp.ne.s32.totalorder %s1683_s29, 0 }
 0x3ab   : > { %p1696_p10 = scmp.ge.s32.totalorder %s1269_s26, 2  ;;  %s891_s14 = scalar_lea.sflag [#allocation5], %s890_s16 }
 0x3ad   : > { %p1054_p12 = pnand %p1696_p10, %p1695_p9 }
 0x3af   : > { %p1055_p13 = pneg %p1054_p12 }
 0x3b1   : > { %1252 = dma.done.wait (%p1055_p13), %s891_s14, 128  }
 0x3b2   : > { %1254 = vsyncadd (%p1055_p13), %s891_s14, 4294967168  ;;  %p21_p0 = scmp.ge.s32.totalorder %s1369_s10, 4   ;;  %s1697_s23 = smov %s1261_s24 }
 0x3b3   : > { %s1698_s24 = smov %s1265_s25  ;;  %s1699_s25 = smov %s1389_s18 }
 0x3b4   : > { %s1700_s26 = smov %s1369_s10  ;;  %23 = sbr.rel (!%p21_p0) target bundleno = 8 (0x8), region = 96 }
 0x3b9   :  { %896 = vsyncpa [#allocation4], 1 }
 0x3ba   :  { %898 = vsyncpa [#allocation4 + $0x1], 1 }
 0x3bb   :  { %899 = vsyncpa [#allocation7], 1 }
 0x3bc   :  { %900 = vsyncpa [#allocation5], 1 }
 0x3bd   :  { %902 = vsyncpa [#allocation5 + $0x1], 1 }

</bundles_post_ra>
